<compile_context>
chip_gen: v7x
topology: tpu7x:2x2x1
jax: 0.10.0
libtpu: 0.0.40
codegen_flags: <defaults>
</compile_context>

<pallas_src>
import functools
import re

import jax
import jax.numpy as jnp
from jax.experimental import pallas as pl
from jax.experimental.pallas import tpu as pltpu

ALPHA = 0.303
BETA = 0.632

_LANE = 128


def _hytana_kernel(x_ref, o_ref, *, compute_dtype):
    x = x_ref[...].astype(compute_dtype)
    y = (0.5 * x) * (1.0 + jnp.tanh(ALPHA + BETA * x))
    o_ref[...] = y.astype(o_ref.dtype)


def _round_up(a: int, b: int) -> int:
    return ((a + b - 1) // b) * b


def _sublane(itemsize: int) -> int:
    # Minimum sublane granule: f32 -> 8, bf16/f16 -> 16, int8/fp8 -> 32.
    return max(8, 32 // itemsize)


@functools.lru_cache(maxsize=None)
def _chip_info():
    """(generation, physical_vmem_bytes) of the default device, with safe fallbacks."""
    gen = 0
    try:
        kind = jax.devices()[0].device_kind
        m = re.search(r"(\d+)", kind)
        if m:
            gen = int(m.group(1))
    except Exception:
        pass
    # Physical VMEM: 128 MiB on v4/v5e/v6e, 64 MiB per TC on v7x; unknown -> 64 MiB.
    if gen and gen <= 3:
        vmem_cap = 16 << 20
    elif gen in (4, 5, 6):
        vmem_cap = 128 << 20
    else:
        vmem_cap = 64 << 20
    try:  # refine if the runtime exposes it
        vmem_cap = int(getattr(pltpu.get_tpu_info(), "vmem_capacity_bytes", vmem_cap))
    except Exception:
        pass
    return gen, vmem_cap


def _default_target_block_bytes(gen: int) -> int:
    if gen and gen <= 3:
        return 2 << 20
    if gen in (4, 5):
        # ~820 GB/s HBM: 4 MiB already amortizes the ~0.35 us step overhead to <4%;
        # bigger blocks only add VMEM pressure on v5e.
        return 4 << 20
    if gen == 6:
        # ~1.4 TB/s HBM, 128 MiB VMEM: room for bigger blocks.
        return 12 << 20
    # v7x / unknown: 3.2 TB/s HBM makes step overhead a ~12% tax at 4 MiB, so aim
    # for ~8 MiB; the 64 MiB VMEM clamp below may shrink it slightly.
    return 8 << 20


def _choose_tiling(rows, cols, itemsize, target_block_bytes, vmem_budget_bytes):
    """Pick (tile_rows, grid_steps) for a (rows, cols) slab streamed through VMEM."""
    sub = _sublane(itemsize)
    a = pl.cdiv(rows, sub)                     # rows, counted in sublane granules
    granule_block = sub * cols * itemsize      # HBM bytes per granule of tile_rows
    # Conservative per-granule VMEM footprint: (in + out) double-buffered plus
    # ~3 block-sized f32 temporaries for the elementwise chain.
    granule_foot = sub * cols * (4 * itemsize + 3 * 4)
    t_target = max(1, target_block_bytes // granule_block)
    t_vmem = max(1, (vmem_budget_bytes - (4 << 20)) // granule_foot)
    t = min(t_target, t_vmem, a)
    if t >= a:
        # Whole slab in a single block (block shape == full array dims, always legal).
        return rows, 1
    grid = pl.cdiv(a, t)
    # v7x megacore: dimension_semantics=("parallel",) shards the 1-D grid across
    # 2 TensorCores, so prefer an even step count (a 3-step grid is a 2+1 split).
    if grid % 2 == 1:
        lo = max(t // 2, 1)                    # shrink the block at most 2x
        for t2 in range(t, lo - 1, -1):
            if pl.cdiv(a, t2) % 2 == 0:
                t = t2
                break
    tile_rows = t * sub
    return tile_rows, pl.cdiv(rows, tile_rows)


def hytana_fwd(x: jax.Array, *, target_block_bytes: int | None = None) -> jax.Array:
    """Elementwise Hytana forward. Accepts any shape; returns same shape/dtype."""
    orig_shape = x.shape
    dtype = x.dtype
    n = x.size
    if n == 0:
        return x
    itemsize = jnp.dtype(dtype).itemsize

    gen, vmem_cap = _chip_info()
    vmem_budget = min(vmem_cap * 3 // 4, 96 << 20)   # ~48 MiB v7x, ~96 MiB v5e/v6e
    if target_block_bytes is None:
        target_block_bytes = _default_target_block_bytes(gen)

    # ---- lane-dense 2-D slab (pad-free whenever total size % 128 == 0) --------
    cols = 0
    for c in (4096, 2048, 1024, 512, 256, _LANE):
        if n % c == 0:
            cols = c
            break
    x_flat = x.reshape(-1)
    pad = 0
    if cols == 0:
        # Rare path: total size is not a multiple of 128 lanes. Zero padding is
        # benign (hytana(0) == 0, padded tail sliced off below) but costs one
        # extra copy pass; every 128-divisible size takes the pad-free path.
        cols = 512 if n >= 512 else _LANE
        pad = _round_up(n, cols) - n
        x_flat = jnp.pad(x_flat, (0, pad))
    rows = x_flat.size // cols
    x2d = x_flat.reshape(rows, cols)

    tile_rows, grid = _choose_tiling(rows, cols, itemsize, target_block_bytes, vmem_budget)

    # Scoped VMEM: in+out double-buffered blocks plus f32 temporaries + slack,
    # never below 32 MiB (v5e's 16 MiB default would otherwise block the pipeline)
    # and never above the per-generation budget.
    block_bytes = tile_rows * cols * itemsize
    block_f32 = tile_rows * cols * 4
    vmem_limit = min(vmem_budget, max(4 * block_bytes + 3 * block_f32 + (4 << 20), 32 << 20))

    # bf16 EUP/VPU exists on v6e/v7x: keep tanh a single native EUP op there so
    # the kernel stays HBM-bound; v5e (and unknown chips) use the f32 upcast.
    compute_dtype = jnp.float32
    if dtype == jnp.bfloat16 and gen >= 6:
        compute_dtype = jnp.bfloat16

    kernel = functools.partial(_hytana_kernel, compute_dtype=compute_dtype)

    out = pl.pallas_call(
        kernel,
        out_shape=jax.ShapeDtypeStruct((rows, cols), dtype),
        grid_spec=pltpu.PrefetchScalarGridSpec(
            num_scalar_prefetch=0,
            grid=(grid,),
            in_specs=[pl.BlockSpec((tile_rows, cols), lambda i: (i, 0))],
            out_specs=pl.BlockSpec((tile_rows, cols), lambda i: (i, 0)),
        ),
        compiler_params=pltpu.CompilerParams(
            dimension_semantics=("parallel",),
            vmem_limit_bytes=int(vmem_limit),
        ),
    )(x2d)

    out = out.reshape(-1)
    if pad:
        out = out[:n]
    return out.reshape(orig_shape)


def hytana_ref(x):
    # Pure-JAX reference mirroring hytana_jit_fwd (f32 math).
    xf = x.astype(jnp.float32)
    return (xf / 2.0 * (1.0 + jnp.tanh(ALPHA + xf * BETA))).astype(x.dtype)


# TODO(synk): backward pass (hytana_jit_bwd) not implemented; only the forward is required here.

if __name__ == "__main__":
    key = jax.random.PRNGKey(0)
    k0, k1, k2, k3, k4 = jax.random.split(key, 5)

    # Small NCHW input consistent with typical activation-module usage.
    x = jax.random.normal(k0, (2, 4, 16, 16), dtype=jnp.float32)
    y = jax.block_until_ready(hytana_fwd(x))
    y_ref = hytana_ref(x)
    assert y.shape == x.shape and y.dtype == x.dtype
    assert jnp.allclose(y, y_ref, atol=1e-6, rtol=1e-6), "f32 mismatch vs reference"

    # Medium input: wide-lane, pad-free path.
    x2 = jax.random.normal(k1, (4, 32, 32, 32), dtype=jnp.float32)
    y2 = jax.block_until_ready(hytana_fwd(x2))
    assert jnp.allclose(y2, hytana_ref(x2), atol=1e-6, rtol=1e-6), "f32 wide mismatch"

    # Multi-step grid path (small target block forces >1 step + even split).
    x3 = jax.random.normal(k2, (8, 64, 64, 32), dtype=jnp.float32)
    y3 = jax.block_until_ready(hytana_fwd(x3, target_block_bytes=1 << 20))
    assert jnp.allclose(y3, hytana_ref(x3), atol=1e-6, rtol=1e-6), "f32 tiled mismatch"

    # Ragged total size (not a multiple of 128) -> padded fallback path.
    x4 = jax.random.normal(k3, (3, 5, 7, 11), dtype=jnp.float32)
    y4 = jax.block_until_ready(hytana_fwd(x4))
    assert jnp.allclose(y4, hytana_ref(x4), atol=1e-6, rtol=1e-6), "ragged mismatch"

    # bf16 end-to-end (native bf16 compute on v6e/v7x, f32 upcast on v5e).
    xb = jax.random.normal(k4, (2, 4, 16, 16), dtype=jnp.bfloat16)
    yb = jax.block_until_ready(hytana_fwd(xb))
    assert yb.dtype == jnp.bfloat16
    assert jnp.allclose(yb.astype(jnp.float32), hytana_ref(xb).astype(jnp.float32),
                        atol=4e-2, rtol=4e-2), "bf16 mismatch vs reference"

    print("KERNEL_OK")
</pallas_src>

<mosaic_0001>
module attributes {stable_mosaic.version = 11 : i64} {
  func.func @_hytana_kernel(%arg0: i32, %arg1: memref<1x2048xf32, #tpu.memory_space<vmem>>, %arg2: memref<1x2048xf32, #tpu.memory_space<vmem>>) attributes {dimension_semantics = [#tpu.dimension_semantics<parallel>], iteration_bounds = array<i64: 1>, scalar_prefetch = 0 : i64, scratch_operands = 0 : i64, tpu.core_type = #tpu.core_type<tc>, window_params = [{transform_indices = @transform_0, window_bounds = array<i64: 1, 2048>}, {transform_indices = @transform_1, window_bounds = array<i64: 1, 2048>}]} {
    %c0 = arith.constant 0 : index
    %c0_0 = arith.constant 0 : index
    %0 = vector.load %arg1[%c0, %c0_0] : memref<1x2048xf32, #tpu.memory_space<vmem>>, vector<1x2048xf32>
    %cst = arith.constant 5.000000e-01 : f32
    %1 = vector.broadcast %cst : f32 to vector<1x2048xf32>
    %2 = arith.mulf %1, %0 : vector<1x2048xf32>
    %cst_1 = arith.constant 6.320000e-01 : f32
    %3 = vector.broadcast %cst_1 : f32 to vector<1x2048xf32>
    %4 = arith.mulf %3, %0 : vector<1x2048xf32>
    %cst_2 = arith.constant 3.030000e-01 : f32
    %5 = vector.broadcast %cst_2 : f32 to vector<1x2048xf32>
    %6 = arith.addf %5, %4 : vector<1x2048xf32>
    %7 = math.tanh %6 : vector<1x2048xf32>
    %cst_3 = arith.constant 1.000000e+00 : f32
    %8 = vector.broadcast %cst_3 : f32 to vector<1x2048xf32>
    %9 = arith.addf %8, %7 : vector<1x2048xf32>
    %10 = arith.mulf %2, %9 : vector<1x2048xf32>
    %c0_4 = arith.constant 0 : index
    %c0_5 = arith.constant 0 : index
    %11 = vector.load %arg2[%c0_4, %c0_5] : memref<1x2048xf32, #tpu.memory_space<vmem>>, vector<1x2048xf32>
    tpu.vector_store %arg2[%c0_4, %c0_5], %10 {strides = array<i32>} : memref<1x2048xf32, #tpu.memory_space<vmem>>, vector<1x2048xf32>,
    return
  }
  func.func @transform_0(%arg0: i32) -> (i32, i32) {
    %c0_i32 = arith.constant 0 : i32
    %c0_i32_0 = arith.constant 0 : i32
    return %arg0, %c0_i32 : i32, i32
  }
  func.func @transform_1(%arg0: i32) -> (i32, i32) {
    %c0_i32 = arith.constant 0 : i32
    %c0_i32_0 = arith.constant 0 : i32
    return %arg0, %c0_i32 : i32, i32
  }
}

</mosaic_0001>

<bundles_post_ra>
// kernel: tpu_custom_call.1
= control target key start
LH: loop header
LB: loop body
LE: loop exit
PB: predicated region body
PF: predicated region fallthrough
CT: control target
= control target key end

     0   :  { %6 = vsyncpa [#allocation3], 0  ;;  %s142_s0 = inlined_call_operand.hbm [shape: f32[1,2048], index: 0, kind: input, shape index: {}]   ;;  %s143_s1 = inlined_call_operand.hbm [shape: f32[1,2048], index: 1, kind: output, shape index: {}]  }
   0x1   :  { %7 = vsyncpa [#allocation4], 0  ;;  %s106_s6 = smov [#allocation2]   ;;  %s58_s10 = scalar_lea.hbm %s142_s0, 256 }
   0x2   :  { %s14_s7 = sshll.u32 %s106_s6, 4  ;;  %p59_p0 = scmp.ne.s32.totalorder %s142_s0, %s58_s10  ;;  %s15_s7 = int_to_ptr.vmem [resolvable:$true] %s14_s7 }
   0x3   :  { %p62_p1 = scmp.lt.u32.totalorder %s58_s10, %s142_s0 }
   0x5   :  { %p64_p2 = pnand %p62_p1, %p59_p0 }
   0x7   :  { %67 = shalt.err (!%p64_p2)
}
   0x8   :  { %s68_s15 = scalar_lea.vmem %s15_s7, 256  ;;  %p73_p4 = scmp.lt.s32.totalorder %s15_s7, %s15_s7 }
   0x9   :  { %p69_p3 = scmp.ne.s32.totalorder %s15_s7, %s68_s15  ;;  %p74_p5 = scmp.lt.s32.totalorder %s68_s15, %s68_s15 }
   0xb   :  { %p75_p6 = por %p74_p5, %p73_p4 }
   0xd   :  { %p76_p7 = pnand %p75_p6, %p69_p3 }
   0xf   :  { %79 = shalt.err (!%p76_p7)
}
  0x10   :  { %17 = dma.hbm_to_vmem [thread:$0]  %s142_s0, 256, %s15_s7, [#allocation3]  }
  0x11   :  { %102 = dma.done.wait [#allocation3], 256  }
  0x12   :  { %103 = vsyncadd [#allocation3], 4294967040  ;;  %v21_v0 = vld [vmem:[#allocation2] sm:$0xff]  ;;  %v22_v1 = vld [vmem:[#allocation2 + $0x8] sm:$0xff]  ;;  %s107_s18 = smov [#allocation5]  }
  0x13   :  { %v25_v2 = vmul.f32 0.632, %v21_v0  ;;  %v26_v3 = vmul.f32 0.632, %v22_v1  ;;  %v23_v6 = vmul.f32 0.5, %v21_v0  ;;  %v24_v8 = vmul.f32 0.5, %v22_v1 }
  0x14   :  { %s43_s19 = sshll.u32 %s107_s18, 4  ;;  %s44_s19 = int_to_ptr.vmem [resolvable:$true] %s43_s19 }
  0x15   :  { %v27_v4 = vadd.f32 0.303, %v25_v2  ;;  %v28_v5 = vadd.f32 0.303, %v26_v3  ;;  %s80_s0 = scalar_lea.vmem %s44_s19, 256  ;;  %p85_p9 = scmp.lt.s32.totalorder %s44_s19, %s44_s19 }
  0x16   :  { %p81_p8 = scmp.ne.s32.totalorder %s44_s19, %s80_s0  ;;  %p86_p10 = scmp.lt.s32.totalorder %s80_s0, %s80_s0 }
  0x17   :  { %54 = vtanh.f32 %v27_v4 }
  0x18   :  { %56 = vtanh.f32 %v28_v5  ;;  %p87_p11 = por %p86_p10, %p85_p9 }
  0x1a   :  { %p88_p12 = pnand %p87_p11, %p81_p8 }
  0x21   :  { %v55_v7 = vpop.eup %54 }
  0x22   :  { %v57_v9 = vpop.eup %56  ;;  %v31_v10 = vadd.f32 1.0, %v55_v7 }
  0x23   :  { %v32_v11 = vadd.f32 1.0, %v57_v9 }
  0x24   :  { %v33_v12 = vmul.f32 %v31_v10, %v23_v6 }
  0x25   :  { %v34_v13 = vmul.f32 %v32_v11, %v24_v8 }
  0x26   :  { %35 = vst [vmem:[#allocation5] sm:$0xff] %v33_v12 }
  0x27   :  { %36 = vst [vmem:[#allocation5 + $0x8] sm:$0xff] %v34_v13 }
  0x28   :  { %91 = shalt.err (!%p88_p12)
}
  0x29   :  { %s92_s22 = scalar_lea.hbm %s143_s1, 256 }
  0x2a   :  { %p93_p13 = scmp.ne.s32.totalorder %s143_s1, %s92_s22  ;;  %p96_p0 = scmp.lt.u32.totalorder %s92_s22, %s143_s1 }
  0x2c   :  { %p98_p1 = pnand %p96_p0, %p93_p13 }
  0x2e   :  { %101 = shalt.err (!%p98_p1)
}
  0x2f   :  { %46 = dma.vmem_to_hbm [thread:$0]  %s44_s19, 256, %s143_s1, [#allocation4]  }
  0x30   :  { %104 = dma.done.wait [#allocation4], 256  }
  0x31   :  { %105 = vsyncadd [#allocation4], 4294967040 }
  0x32   :  { %50 = vsyncpa [#allocation3], 1 }
  0x33   :  { %51 = vsyncpa [#allocation4], 1 }

</bundles_post_ra>
